<compile_context>
chip_gen: v5e
topology: v5e:2x2
jax: 0.10.0
libtpu: 0.0.40
codegen_flags: <defaults>
</compile_context>

<pallas_src>
import functools

import jax
import jax.numpy as jnp
from jax.experimental import pallas as pl
from jax.experimental.pallas import tpu as pltpu


# ---------------------------------------------------------------------------
# Activations (mirror of ModelBase._get_activation; slope=0.1 matches the
# default in ModelBase._get_activation, not nn.LeakyReLU's 0.01).
# ---------------------------------------------------------------------------
def _leaky_relu(x, slope=0.1):
    return jnp.where(x >= 0, x, slope * x)


def get_activation(activation_type, slope=0.1):
    str_to_act = {
        "relu": lambda x: jnp.maximum(x, 0.0),
        "leaky_relu": lambda x: _leaky_relu(x, slope),
        "sigmoid": jax.nn.sigmoid,
        "tanh": jnp.tanh,
        "swish": jax.nn.silu,
        "silu": jax.nn.silu,
    }
    try:
        return str_to_act[activation_type.lower()]
    except KeyError as exc:
        raise NotImplementedError(
            f"Invalid activation. Choose from {list(str_to_act.keys())}."
        ) from exc


# ---------------------------------------------------------------------------
# Tiling heuristics
# ---------------------------------------------------------------------------
_LANE = 128
_SUBLANE = 8
_MAX_TILE_C = 2048              # lane-tile width when the spatial axis is large
_TARGET_TILE_BYTES = 2 << 20    # ~2 MiB data tile -> ~9 MiB live (dbl-buffered),
                                # comfortably under the 16 MiB scoped-VMEM
                                # default on v5e and 32 MiB on v6e/v7x.


def _choose_tiles(rows, cols, itemsize):
    # Lane (last) dim: full spatial extent (always legal) or a large multiple
    # of 128 so stores stay unmasked and lane-dense.
    # TODO(synk): if H*W is large and not a multiple of 128, a flat lane-dense
    # repack would avoid masked edge stores; not needed for these shapes.
    tile_c = cols if cols <= _MAX_TILE_C else _MAX_TILE_C
    # Sublane (row) dim: multiple of 8 sized to the per-tile VMEM budget.
    max_r = max(_SUBLANE, _TARGET_TILE_BYTES // max(1, tile_c * itemsize))
    tile_r = min(rows, max_r)
    if tile_r < rows:
        tile_r = max(_SUBLANE, (tile_r // _SUBLANE) * _SUBLANE)
    return tile_r, tile_c


# ---------------------------------------------------------------------------
# Pallas kernels (elementwise hot path on a (rows, cols) slab)
# ---------------------------------------------------------------------------
def _apply_std_kernel(x_ref, mu_ref, inv_sigma_ref, o_ref):
    # (x - mu) * (1/sigma); mu/inv_sigma are (TILE_R, 1), broadcast over lanes.
    x = x_ref[...].astype(jnp.float32)
    o_ref[...] = ((x - mu_ref[...]) * inv_sigma_ref[...]).astype(o_ref.dtype)


def _reverse_std_kernel(x_ref, mu_ref, sigma_ref, o_ref):
    # x * sigma + mu
    x = x_ref[...].astype(jnp.float32)
    o_ref[...] = (x * sigma_ref[...] + mu_ref[...]).astype(o_ref.dtype)


def _activation_kernel(x_ref, o_ref, *, act_fn):
    o_ref[...] = act_fn(x_ref[...].astype(jnp.float32)).astype(o_ref.dtype)


def _fused_forward_kernel(x_ref, mu_ref, sigma_ref, inv_sigma_ref, o_ref, *, act_fn):
    # standardize -> activation -> reverse-standardize, one HBM pass.
    x = x_ref[...].astype(jnp.float32)
    mu = mu_ref[...]
    z = act_fn((x - mu) * inv_sigma_ref[...])
    o_ref[...] = (z * sigma_ref[...] + mu).astype(o_ref.dtype)


def _elementwise_call(kernel, x2d, row_arrays=()):
    rows, cols = x2d.shape
    tile_r, tile_c = _choose_tiles(rows, cols, jnp.dtype(x2d.dtype).itemsize)
    grid = (pl.cdiv(rows, tile_r), pl.cdiv(cols, tile_c))
    in_specs = [pl.BlockSpec((tile_r, tile_c), lambda i, j: (i, j))]
    # Per-row stats follow the row tile; lane dim 1 equals full array width.
    in_specs += [pl.BlockSpec((tile_r, 1), lambda i, j: (i, 0)) for _ in row_arrays]
    return pl.pallas_call(
        kernel,
        out_shape=jax.ShapeDtypeStruct((rows, cols), x2d.dtype),
        grid=grid,
        in_specs=in_specs,
        out_specs=pl.BlockSpec((tile_r, tile_c), lambda i, j: (i, j)),
        compiler_params=pltpu.CompilerParams(
            dimension_semantics=("parallel", "parallel"),
        ),
    )(x2d, *row_arrays)


# ---------------------------------------------------------------------------
# Wrappers (NCHW glue around the kernels)
# ---------------------------------------------------------------------------
def _per_row(vec_c, B, C):
    # (C,) -> (B*C, 1) f32, row r corresponds to channel r % C.
    v = vec_c.astype(jnp.float32).reshape(1, C)
    return jnp.broadcast_to(v, (B, C)).reshape(B * C, 1)


def apply_standardization(batch, mu, sigma):
    """(batch - mu) / sigma, NCHW batch, mu/sigma shape (C,)."""
    B, C, H, W = batch.shape
    x2d = batch.reshape(B * C, H * W)
    mu_rows = _per_row(mu, B, C)
    inv_sigma_rows = _per_row(1.0 / sigma.astype(jnp.float32), B, C)
    out = _elementwise_call(_apply_std_kernel, x2d, (mu_rows, inv_sigma_rows))
    return out.reshape(B, C, H, W)


def reverse_standardization(batch, mu, sigma):
    """batch * sigma + mu, NCHW batch, mu/sigma shape (C,)."""
    B, C, H, W = batch.shape
    x2d = batch.reshape(B * C, H * W)
    mu_rows = _per_row(mu, B, C)
    sigma_rows = _per_row(sigma, B, C)
    out = _elementwise_call(_reverse_std_kernel, x2d, (mu_rows, sigma_rows))
    return out.reshape(B, C, H, W)


def apply_activation(batch, activation_type="relu", slope=0.1):
    """Elementwise activation (ModelBase.activation) on an NCHW batch."""
    B, C, H, W = batch.shape
    x2d = batch.reshape(B * C, H * W)
    act_fn = get_activation(activation_type, slope)
    kernel = functools.partial(_activation_kernel, act_fn=act_fn)
    out = _elementwise_call(kernel, x2d)
    return out.reshape(B, C, H, W)


def model_base_forward(batch, mu, sigma, activation_type="relu", slope=0.1):
    """Fused demo 'forward' using only the concrete pieces ModelBase defines:
    apply_standardization -> activation -> reverse_standardization in ONE pass.
    # TODO(synk): ModelBase.forward / _initialize_architecture are abstract;
    # no architecture-specific layers exist to translate here.
    """
    B, C, H, W = batch.shape
    x2d = batch.reshape(B * C, H * W)
    mu_rows = _per_row(mu, B, C)
    sigma_rows = _per_row(sigma, B, C)
    inv_sigma_rows = _per_row(1.0 / sigma.astype(jnp.float32), B, C)
    act_fn = get_activation(activation_type, slope)
    kernel = functools.partial(_fused_forward_kernel, act_fn=act_fn)
    out = _elementwise_call(kernel, x2d, (mu_rows, sigma_rows, inv_sigma_rows))
    return out.reshape(B, C, H, W)


# ---------------------------------------------------------------------------
# Pure-JAX references (for correctness check)
# ---------------------------------------------------------------------------
def _ref_apply_std(batch, mu, sigma):
    C = mu.shape[0]
    return (batch - mu.reshape(1, C, 1, 1)) / sigma.reshape(1, C, 1, 1)


def _ref_reverse_std(batch, mu, sigma):
    C = mu.shape[0]
    return batch * sigma.reshape(1, C, 1, 1) + mu.reshape(1, C, 1, 1)


def _ref_forward(batch, mu, sigma, activation_type="relu"):
    act = get_activation(activation_type)
    return _ref_reverse_std(act(_ref_apply_std(batch, mu, sigma)), mu, sigma)


if __name__ == "__main__":
    key = jax.random.PRNGKey(0)
    B, C, H, W = 2, 4, 16, 16

    k_x, k_mu, k_sig = jax.random.split(key, 3)
    x = jax.random.normal(k_x, (B, C, H, W), dtype=jnp.float32)

    # Buffers as registered by ModelBase._register_standardization_buffer:
    std_mu = jnp.zeros((C,), dtype=jnp.float32)
    std_sigma = jnp.ones((C,), dtype=jnp.float32)

    # Non-trivial mu/sigma to exercise the broadcast arithmetic.
    mu_test = jax.random.normal(k_mu, (C,), dtype=jnp.float32)
    sigma_test = jax.random.uniform(k_sig, (C,), dtype=jnp.float32) + 0.5

    # Run kernels.
    y_std_default = jax.block_until_ready(apply_standardization(x, std_mu, std_sigma))
    y_std = jax.block_until_ready(apply_standardization(x, mu_test, sigma_test))
    y_rev = jax.block_until_ready(reverse_standardization(y_std, mu_test, sigma_test))
    y_act = jax.block_until_ready(apply_activation(x, "relu"))
    y_swish = jax.block_until_ready(apply_activation(x, "swish"))
    y_fwd = jax.block_until_ready(model_base_forward(x, mu_test, sigma_test, "relu"))

    # Verify against pure-JAX references.
    assert jnp.allclose(y_std_default, x, atol=1e-6)  # mu=0, sigma=1 -> identity
    assert jnp.allclose(y_std, _ref_apply_std(x, mu_test, sigma_test),
                        atol=1e-5, rtol=1e-5)
    assert jnp.allclose(y_rev, x, atol=1e-5, rtol=1e-5)  # reverse undoes apply
    assert jnp.allclose(y_act, jnp.maximum(x, 0.0), atol=1e-6)
    assert jnp.allclose(y_swish, jax.nn.silu(x), atol=1e-5, rtol=1e-5)
    assert jnp.allclose(y_fwd, _ref_forward(x, mu_test, sigma_test, "relu"),
                        atol=1e-5, rtol=1e-5)

    print("KERNEL_OK")
</pallas_src>

<mosaic_0001>
module attributes {stable_mosaic.version = 11 : i64} {
  func.func @_apply_std_kernel(%arg0: i32, %arg1: i32, %arg2: memref<8x256xf32, #tpu.memory_space<vmem>>, %arg3: memref<8x1xf32, #tpu.memory_space<vmem>>, %arg4: memref<8x1xf32, #tpu.memory_space<vmem>>, %arg5: memref<8x256xf32, #tpu.memory_space<vmem>>) attributes {dimension_semantics = [#tpu.dimension_semantics<parallel>, #tpu.dimension_semantics<parallel>], iteration_bounds = array<i64: 1, 1>, scalar_prefetch = 0 : i64, scratch_operands = 0 : i64, tpu.core_type = #tpu.core_type<tc>, window_params = [{transform_indices = @transform_0, window_bounds = array<i64: 8, 256>}, {transform_indices = @transform_1, window_bounds = array<i64: 8, 1>}, {transform_indices = @transform_2, window_bounds = array<i64: 8, 1>}, {transform_indices = @transform_3, window_bounds = array<i64: 8, 256>}]} {
    %c0 = arith.constant 0 : index
    %c0_0 = arith.constant 0 : index
    %0 = vector.load %arg2[%c0, %c0_0] : memref<8x256xf32, #tpu.memory_space<vmem>>, vector<8x256xf32>
    %c0_1 = arith.constant 0 : index
    %c0_2 = arith.constant 0 : index
    %1 = vector.load %arg3[%c0_1, %c0_2] : memref<8x1xf32, #tpu.memory_space<vmem>>, vector<8x1xf32>
    %2 = vector.broadcast %1 : vector<8x1xf32> to vector<8x256xf32>
    %3 = arith.subf %0, %2 : vector<8x256xf32>
    %c0_3 = arith.constant 0 : index
    %c0_4 = arith.constant 0 : index
    %4 = vector.load %arg4[%c0_3, %c0_4] : memref<8x1xf32, #tpu.memory_space<vmem>>, vector<8x1xf32>
    %5 = vector.broadcast %4 : vector<8x1xf32> to vector<8x256xf32>
    %6 = arith.mulf %3, %5 : vector<8x256xf32>
    %c0_5 = arith.constant 0 : index
    %c0_6 = arith.constant 0 : index
    %7 = vector.load %arg5[%c0_5, %c0_6] : memref<8x256xf32, #tpu.memory_space<vmem>>, vector<8x256xf32>
    tpu.vector_store %arg5[%c0_5, %c0_6], %6 {strides = array<i32>} : memref<8x256xf32, #tpu.memory_space<vmem>>, vector<8x256xf32>,
    return
  }
  func.func @transform_0(%arg0: i32, %arg1: i32) -> (i32, i32) {
    %c0_i32 = arith.constant 0 : i32
    return %arg0, %arg1 : i32, i32
  }
  func.func @transform_1(%arg0: i32, %arg1: i32) -> (i32, i32) {
    %c0_i32 = arith.constant 0 : i32
    %c0_i32_0 = arith.constant 0 : i32
    return %arg0, %c0_i32 : i32, i32
  }
  func.func @transform_2(%arg0: i32, %arg1: i32) -> (i32, i32) {
    %c0_i32 = arith.constant 0 : i32
    %c0_i32_0 = arith.constant 0 : i32
    return %arg0, %c0_i32 : i32, i32
  }
  func.func @transform_3(%arg0: i32, %arg1: i32) -> (i32, i32) {
    %c0_i32 = arith.constant 0 : i32
    return %arg0, %arg1 : i32, i32
  }
}

</mosaic_0001>

<bundles_post_ra>
// kernel: tpu_custom_call.1
= control target key start
LH: loop header
LB: loop body
LE: loop exit
PB: predicated region body
PF: predicated region fallthrough
CT: control target
= control target key end

     0   :  { %s117_s0 = inlined_call_operand.vmem [shape: f32[8,256], index: 0, kind: input, shape index: {}]   ;;  %s118_s1 = inlined_call_operand.vmem [shape: f32[8,1], index: 1, kind: input, shape index: {}]   ;;  %s119_s2 = inlined_call_operand.vmem [shape: f32[8,1], index: 2, kind: input, shape index: {}]   ;;  %s120_s3 = inlined_call_operand.hbm [shape: f32[8,256], index: 3, kind: output, shape index: {}]  }
   0x1   :  { %v17_v0 = vld [vmem:[%s118_s1] sm:$0xff] }
   0x2   :  { %8 = vsyncpa [#allocation3], 0  ;;  %v80_v1 = vmov 0   ;;  %v25_v2 = vld [vmem:[%s119_s2] sm:$0xff]  ;;  %v16_v5 = vld [vmem:[%s117_s0 + $0x8] sm:$0xff]  ;;  %s81_s1 = smov [#allocation2]  }
   0x3   :  { %53 = vset.pattern.permute.xlu0 %v80_v1  ;;  %v15_v4 = vld [vmem:[%s117_s0] sm:$0xff]  ;;  %s40_s20 = sshll.u32 %s81_s1, 4  ;;  %s42_s23 = sshll.u32 %s120_s3, 4  ;;  %s41_s20 = int_to_ptr.vmem [resolvable:$true] %s40_s20  ;;  %s43_s23 = int_to_ptr.hbm [resolvable:$true] %s42_s23 }
   0x4   :  { %20 = vperm.xlu0 %53, %v17_v0  }
   0xc   :  { %28 = vperm.xlu0 %53, %v25_v2  }
  0x76   :  { %v21_v3 = vpop.permute.xlu0 %20 }
  0x77   :  { %v23_v6 = vsub.f32 %v15_v4, %v21_v3  ;;  %v24_v7 = vsub.f32 %v16_v5, %v21_v3 }
  0x7e   :  { %v29_v8 = vpop.permute.xlu0 %28 }
  0x7f   :  { %v31_v9 = vmul.f32 %v29_v8, %v23_v6  ;;  %v32_v10 = vmul.f32 %v29_v8, %v24_v7 }
  0x81   :  { %33 = vst [vmem:[#allocation2] sm:$0xff] %v31_v9 }
  0x82   :  { %34 = vst [vmem:[#allocation2 + $0x8] sm:$0xff] %v32_v10 }
  0x83   :  { %45 = dma.vmem_to_hbm [thread:$0]  %s41_s20, 256, %s43_s23, [#allocation3]  }
  0x84   :  { %78 = dma.done.wait [#allocation3], 256  }
  0x85   :  { %79 = vsyncadd [#allocation3], 4294967040 }
  0x86   :  { %50 = vsyncpa [#allocation3], 1 }

</bundles_post_ra>
